<compile_context>
chip_gen: v6e
topology: v6e:2x2x1
jax: 0.10.0
libtpu: 0.0.40
codegen_flags: <defaults>
</compile_context>

<pallas_src>
import jax
import jax.numpy as jnp
from jax import lax
from jax.experimental import pallas as pl
from jax.experimental.pallas import tpu as pltpu

# Small, self-consistent config (the module hard-codes N_EMBD=384; scaled down here,
# keeping num_heads * head_size == N_EMBD).
N_EMBD = 32
NUM_HEADS = 4
HEAD_SIZE = 8
B = 2
T = 8          # sequence length (<= MAX_CONTEXT_LEN, so only tril[:T,:T] matters)
LANE = 128     # padded output width -> lane-dense stores
NEG_BIG = -1e30  # plain Python float (scalar literal, not a captured device constant)


def mha_kernel(x_ref, wq_ref, wk_ref, wvp_ref, bp_ref, o_ref):
    """One grid step == one batch element.  x_ref: (T, C); o_ref: (T, LANE)."""
    nt = x_ref.shape[0]
    x_bf = x_ref[...].astype(jnp.bfloat16)                        # (T, C)

    # Fused projections, one MXU push each.  Scale is folded into Wq; Wv∘Wp is
    # pre-fused so V is produced directly in the padded 128-lane output basis.
    q_all = jnp.dot(x_bf, wq_ref[...], preferred_element_type=jnp.float32)    # (T, H*hs)
    k_all = jnp.dot(x_bf, wk_ref[...], preferred_element_type=jnp.float32)    # (T, H*hs)
    vp_all = jnp.dot(x_bf, wvp_ref[...], preferred_element_type=jnp.float32)  # (T, H*128)

    # Causal (lower-triangular) mask, equivalent to tril[:T, :T] == 0 -> -inf.
    rows = lax.broadcasted_iota(jnp.int32, (nt, nt), 0)
    cols = lax.broadcasted_iota(jnp.int32, (nt, nt), 1)
    causal = cols <= rows

    acc = jnp.zeros((nt, LANE), jnp.float32)
    for h in range(NUM_HEADS):                 # short static unroll (4 heads)
        cs = slice(h * HEAD_SIZE, (h + 1) * HEAD_SIZE)
        qh = q_all[:, cs].astype(jnp.bfloat16)                     # (T, hs)
        kh = k_all[:, cs].astype(jnp.bfloat16)                     # (T, hs)

        # q @ k^T without materializing a transpose (scale already in Wq).
        s = lax.dot_general(qh, kh, (((1,), (1,)), ((), ())),
                            preferred_element_type=jnp.float32)    # (T, T)
        s = jnp.where(causal, s, NEG_BIG)

        # numerically stable softmax along the last axis
        m = jnp.max(s, axis=-1, keepdims=True)
        p = jnp.exp(s - m)
        a = p / jnp.sum(p, axis=-1, keepdims=True)
        # attention dropout: identity in eval mode

        vph = vp_all[:, h * LANE:(h + 1) * LANE].astype(jnp.bfloat16)   # (T, 128)
        acc = acc + jnp.dot(a.astype(jnp.bfloat16), vph,
                            preferred_element_type=jnp.float32)    # lane-dense value dot

    # residual dropout: identity in eval mode; single unmasked full-width store
    o_ref[...] = (acc + bp_ref[...]).astype(o_ref.dtype)


def multi_head_attention(x, wq, wk, wv, wp, bp):
    Bx, Tx, C = x.shape
    H = NUM_HEADS * HEAD_SIZE

    # ---- one-time weight transforms (parameter-setup time, not per-activation) ----
    scale = HEAD_SIZE ** (-0.5)
    wq_bf = (wq * scale).astype(jnp.bfloat16)           # fold 1/sqrt(hs) into Wq
    wk_bf = wk.astype(jnp.bfloat16)
    # Zero-pad the output projection to a 128-lane slab, then fuse it with Wv per head.
    wp_pad = jnp.zeros((H, LANE), jnp.float32).at[:, :N_EMBD].set(wp)
    wvp = jnp.concatenate(
        [wv[:, h * HEAD_SIZE:(h + 1) * HEAD_SIZE]
         @ wp_pad[h * HEAD_SIZE:(h + 1) * HEAD_SIZE, :]
         for h in range(NUM_HEADS)], axis=-1)           # (C, H*LANE)
    wvp_bf = wvp.astype(jnp.bfloat16)
    bp_pad = jnp.zeros((1, LANE), jnp.float32).at[:, :N_EMBD].set(bp)

    # Advisory cost estimate so XLA can schedule around this latency-bound call.
    flops = (
        2 * Bx * Tx * C * H * 2                          # Q and K projections
        + 2 * Bx * Tx * C * (NUM_HEADS * LANE)           # fused V∘proj projection
        + Bx * NUM_HEADS * (2 * Tx * Tx * HEAD_SIZE      # q @ k^T
                            + 2 * Tx * Tx * LANE)        # a @ v'
    )
    transcendentals = Bx * NUM_HEADS * Tx * Tx           # exp in softmax
    bytes_accessed = (
        4 * x.size + 2 * (wq_bf.size + wk_bf.size + wvp_bf.size)
        + 4 * bp_pad.size + 4 * Bx * Tx * LANE
    )

    out_pad = pl.pallas_call(
        mha_kernel,
        out_shape=jax.ShapeDtypeStruct((Bx, Tx, LANE), jnp.float32),
        grid_spec=pltpu.PrefetchScalarGridSpec(
            num_scalar_prefetch=0,
            grid=(Bx,),                                   # one step per batch element
            in_specs=[
                pl.BlockSpec((None, Tx, C), lambda b: (b, 0, 0)),           # x slab
                pl.BlockSpec((C, H), lambda b: (0, 0)),                     # Wq (scaled)
                pl.BlockSpec((C, H), lambda b: (0, 0)),                     # Wk
                pl.BlockSpec((C, NUM_HEADS * LANE), lambda b: (0, 0)),      # Wv∘Wp fused
                pl.BlockSpec((1, LANE), lambda b: (0, 0)),                  # bproj (padded)
            ],
            out_specs=pl.BlockSpec((None, Tx, LANE), lambda b: (b, 0, 0)),
        ),
        compiler_params=pltpu.CompilerParams(
            dimension_semantics=("parallel",),            # batch shards across TCs on v7x
        ),
        cost_estimate=pl.CostEstimate(
            flops=flops,
            transcendentals=transcendentals,
            bytes_accessed=bytes_accessed,
        ),
    )(x, wq_bf, wk_bf, wvp_bf, bp_pad)

    # Un-pad the lane-dense slab back to N_EMBD (pure layout plumbing in the wrapper).
    return out_pad[:, :, :N_EMBD]


def reference_mha(x, wq, wk, wv, wp, bp):
    """Pure-JAX f32 reference mirroring the PyTorch forward (eval mode)."""
    Bx, Tx, C = x.shape
    q = x @ wq
    k = x @ wk
    v = x @ wv
    rows = jnp.arange(Tx)[:, None]
    cols = jnp.arange(Tx)[None, :]
    causal = cols <= rows
    outs = []
    for h in range(NUM_HEADS):
        sl = slice(h * HEAD_SIZE, (h + 1) * HEAD_SIZE)
        s = jnp.einsum("btd,bsd->bts", q[..., sl], k[..., sl]) * HEAD_SIZE ** (-0.5)
        s = jnp.where(causal[None], s, -jnp.inf)
        a = jax.nn.softmax(s, axis=-1)
        outs.append(jnp.einsum("bts,bsd->btd", a, v[..., sl]))
    concat = jnp.concatenate(outs, axis=-1)
    return concat @ wp + bp[0]


if __name__ == "__main__":
    key = jax.random.PRNGKey(0)
    kx, kq, kk, kv, kp, kb = jax.random.split(key, 6)

    H = NUM_HEADS * HEAD_SIZE
    x = jax.random.normal(kx, (B, T, N_EMBD), dtype=jnp.float32)
    wq = jax.random.normal(kq, (N_EMBD, H), dtype=jnp.float32) * 0.1
    wk = jax.random.normal(kk, (N_EMBD, H), dtype=jnp.float32) * 0.1
    wv = jax.random.normal(kv, (N_EMBD, H), dtype=jnp.float32) * 0.1
    wp = jax.random.normal(kp, (H, N_EMBD), dtype=jnp.float32) * 0.1
    bp = jax.random.normal(kb, (1, N_EMBD), dtype=jnp.float32) * 0.1

    out = multi_head_attention(x, wq, wk, wv, wp, bp)
    out = jax.block_until_ready(out)

    ref = reference_mha(x, wq, wk, wv, wp, bp)
    assert out.shape == (B, T, N_EMBD), out.shape
    # bf16 MXU operands (f32 accumulation) vs. f32 reference -> relaxed tolerance.
    max_err = float(jnp.max(jnp.abs(out - ref)))
    assert jnp.allclose(out, ref, atol=3e-2, rtol=3e-2), max_err

    print("KERNEL_OK")
</pallas_src>

<mosaic_0001>
module attributes {stable_mosaic.version = 11 : i64} {
  func.func @mha_kernel(%arg0: i32, %arg1: memref<1x8x32xf32, #tpu.memory_space<vmem>>, %arg2: memref<32x32xbf16, #tpu.memory_space<vmem>>, %arg3: memref<32x32xbf16, #tpu.memory_space<vmem>>, %arg4: memref<32x512xbf16, #tpu.memory_space<vmem>>, %arg5: memref<1x128xf32, #tpu.memory_space<vmem>>, %arg6: memref<1x8x128xf32, #tpu.memory_space<vmem>>) attributes {dimension_semantics = [#tpu.dimension_semantics<parallel>], iteration_bounds = array<i64: 2>, scalar_prefetch = 0 : i64, scratch_operands = 0 : i64, tpu.core_type = #tpu.core_type<tc>, window_params = [{transform_indices = @transform_0, window_bounds = array<i64: 1, 8, 32>}, {pipeline_mode = #tpu.pipeline_mode<synchronous>, transform_indices = @transform_1, window_bounds = array<i64: 32, 32>}, {pipeline_mode = #tpu.pipeline_mode<synchronous>, transform_indices = @transform_2, window_bounds = array<i64: 32, 32>}, {pipeline_mode = #tpu.pipeline_mode<synchronous>, transform_indices = @transform_3, window_bounds = array<i64: 32, 512>}, {pipeline_mode = #tpu.pipeline_mode<synchronous>, transform_indices = @transform_4, window_bounds = array<i64: 1, 128>}, {transform_indices = @transform_5, window_bounds = array<i64: 1, 8, 128>}]} {
    %c0 = arith.constant 0 : index
    %c0_0 = arith.constant 0 : index
    %c0_1 = arith.constant 0 : index
    %0 = vector.load %arg1[%c0, %c0_0, %c0_1] : memref<1x8x32xf32, #tpu.memory_space<vmem>>, vector<1x8x32xf32>
    %1 = vector.shape_cast %0 : vector<1x8x32xf32> to vector<8x32xf32>
    %2 = arith.truncf %1 : vector<8x32xf32> to vector<8x32xbf16>
    %c0_2 = arith.constant 0 : index
    %c0_3 = arith.constant 0 : index
    %3 = vector.load %arg2[%c0_2, %c0_3] : memref<32x32xbf16, #tpu.memory_space<vmem>>, vector<32x32xbf16>
    %cst = arith.constant dense<0.000000e+00> : vector<8x32xf32>
    %4 = tpu.matmul %2, %3, %cst {dimension_numbers = #tpu.dot_dimension_numbers<[1], [0], [0], [1], [0, 0, 1, 1], [], []>} : vector<8x32xbf16>, vector<32x32xbf16>, vector<8x32xf32> -> vector<8x32xf32>
    %c0_4 = arith.constant 0 : index
    %c0_5 = arith.constant 0 : index
    %5 = vector.load %arg3[%c0_4, %c0_5] : memref<32x32xbf16, #tpu.memory_space<vmem>>, vector<32x32xbf16>
    %cst_6 = arith.constant dense<0.000000e+00> : vector<8x32xf32>
    %6 = tpu.matmul %2, %5, %cst_6 {dimension_numbers = #tpu.dot_dimension_numbers<[1], [0], [0], [1], [0, 0, 1, 1], [], []>} : vector<8x32xbf16>, vector<32x32xbf16>, vector<8x32xf32> -> vector<8x32xf32>
    %c0_7 = arith.constant 0 : index
    %c0_8 = arith.constant 0 : index
    %7 = vector.load %arg4[%c0_7, %c0_8] : memref<32x512xbf16, #tpu.memory_space<vmem>>, vector<32x512xbf16>
    %cst_9 = arith.constant dense<0.000000e+00> : vector<8x512xf32>
    %8 = tpu.matmul %2, %7, %cst_9 {dimension_numbers = #tpu.dot_dimension_numbers<[1], [0], [0], [1], [0, 0, 1, 1], [], []>} : vector<8x32xbf16>, vector<32x512xbf16>, vector<8x512xf32> -> vector<8x512xf32>
    %9 = tpu.iota {dimensions = array<i32: 0>} : vector<8x8xi32>
    %10 = tpu.iota {dimensions = array<i32: 1>} : vector<8x8xi32>
    %11 = arith.cmpi sle, %10, %9 : vector<8x8xi32>
    %cst_10 = arith.constant 0.000000e+00 : f32
    %12 = vector.broadcast %cst_10 : f32 to vector<8x128xf32>
    %13 = vector.extract_strided_slice %4 {offsets = [0, 0], sizes = [8, 8], strides = [1, 1]} : vector<8x32xf32> to vector<8x8xf32>
    %14 = arith.truncf %13 : vector<8x8xf32> to vector<8x8xbf16>
    %15 = vector.extract_strided_slice %6 {offsets = [0, 0], sizes = [8, 8], strides = [1, 1]} : vector<8x32xf32> to vector<8x8xf32>
    %16 = arith.truncf %15 : vector<8x8xf32> to vector<8x8xbf16>
    %cst_11 = arith.constant dense<0.000000e+00> : vector<8x8xf32>
    %17 = tpu.matmul %14, %16, %cst_11 {dimension_numbers = #tpu.dot_dimension_numbers<[1], [1], [0], [0], [0, 0, 1, 0], [], []>} : vector<8x8xbf16>, vector<8x8xbf16>, vector<8x8xf32> -> vector<8x8xf32>
    %cst_12 = arith.constant -1.000000e+30 : f32
    %18 = vector.broadcast %cst_12 : f32 to vector<8x8xf32>
    %19 = arith.select %11, %17, %18 : vector<8x8xi1>, vector<8x8xf32>
    %cst_13 = arith.constant dense<0xFF800000> : vector<8xf32>
    %20 = vector.multi_reduction <maximumf>, %19, %cst_13 [1] : vector<8x8xf32> to vector<8xf32>
    %21 = vector.shape_cast %20 : vector<8xf32> to vector<8x1xf32>
    %22 = vector.broadcast %21 : vector<8x1xf32> to vector<8x8xf32>
    %23 = arith.subf %19, %22 : vector<8x8xf32>
    %24 = math.exp %23 : vector<8x8xf32>
    %cst_14 = arith.constant dense<0.000000e+00> : vector<8xf32>
    %25 = vector.multi_reduction <add>, %24, %cst_14 [1] : vector<8x8xf32> to vector<8xf32>
    %26 = vector.shape_cast %25 : vector<8xf32> to vector<8x1xf32>
    %27 = vector.broadcast %26 : vector<8x1xf32> to vector<8x8xf32>
    %28 = arith.divf %24, %27 : vector<8x8xf32>
    %29 = vector.extract_strided_slice %8 {offsets = [0, 0], sizes = [8, 128], strides = [1, 1]} : vector<8x512xf32> to vector<8x128xf32>
    %30 = arith.truncf %29 : vector<8x128xf32> to vector<8x128xbf16>
    %31 = arith.truncf %28 : vector<8x8xf32> to vector<8x8xbf16>
    %cst_15 = arith.constant dense<0.000000e+00> : vector<8x128xf32>
    %32 = tpu.matmul %31, %30, %cst_15 {dimension_numbers = #tpu.dot_dimension_numbers<[1], [0], [0], [1], [0, 0, 1, 1], [], []>} : vector<8x8xbf16>, vector<8x128xbf16>, vector<8x128xf32> -> vector<8x128xf32>
    %33 = arith.addf %12, %32 : vector<8x128xf32>
    %34 = vector.extract_strided_slice %4 {offsets = [0, 8], sizes = [8, 8], strides = [1, 1]} : vector<8x32xf32> to vector<8x8xf32>
    %35 = arith.truncf %34 : vector<8x8xf32> to vector<8x8xbf16>
    %36 = vector.extract_strided_slice %6 {offsets = [0, 8], sizes = [8, 8], strides = [1, 1]} : vector<8x32xf32> to vector<8x8xf32>
    %37 = arith.truncf %36 : vector<8x8xf32> to vector<8x8xbf16>
    %cst_16 = arith.constant dense<0.000000e+00> : vector<8x8xf32>
    %38 = tpu.matmul %35, %37, %cst_16 {dimension_numbers = #tpu.dot_dimension_numbers<[1], [1], [0], [0], [0, 0, 1, 0], [], []>} : vector<8x8xbf16>, vector<8x8xbf16>, vector<8x8xf32> -> vector<8x8xf32>
    %cst_17 = arith.constant -1.000000e+30 : f32
    %39 = vector.broadcast %cst_17 : f32 to vector<8x8xf32>
    %40 = arith.select %11, %38, %39 : vector<8x8xi1>, vector<8x8xf32>
    %cst_18 = arith.constant dense<0xFF800000> : vector<8xf32>
    %41 = vector.multi_reduction <maximumf>, %40, %cst_18 [1] : vector<8x8xf32> to vector<8xf32>
    %42 = vector.shape_cast %41 : vector<8xf32> to vector<8x1xf32>
    %43 = vector.broadcast %42 : vector<8x1xf32> to vector<8x8xf32>
    %44 = arith.subf %40, %43 : vector<8x8xf32>
    %45 = math.exp %44 : vector<8x8xf32>
    %cst_19 = arith.constant dense<0.000000e+00> : vector<8xf32>
    %46 = vector.multi_reduction <add>, %45, %cst_19 [1] : vector<8x8xf32> to vector<8xf32>
    %47 = vector.shape_cast %46 : vector<8xf32> to vector<8x1xf32>
    %48 = vector.broadcast %47 : vector<8x1xf32> to vector<8x8xf32>
    %49 = arith.divf %45, %48 : vector<8x8xf32>
    %50 = vector.extract_strided_slice %8 {offsets = [0, 128], sizes = [8, 128], strides = [1, 1]} : vector<8x512xf32> to vector<8x128xf32>
    %51 = arith.truncf %50 : vector<8x128xf32> to vector<8x128xbf16>
    %52 = arith.truncf %49 : vector<8x8xf32> to vector<8x8xbf16>
    %cst_20 = arith.constant dense<0.000000e+00> : vector<8x128xf32>
    %53 = tpu.matmul %52, %51, %cst_20 {dimension_numbers = #tpu.dot_dimension_numbers<[1], [0], [0], [1], [0, 0, 1, 1], [], []>} : vector<8x8xbf16>, vector<8x128xbf16>, vector<8x128xf32> -> vector<8x128xf32>
    %54 = arith.addf %33, %53 : vector<8x128xf32>
    %55 = vector.extract_strided_slice %4 {offsets = [0, 16], sizes = [8, 8], strides = [1, 1]} : vector<8x32xf32> to vector<8x8xf32>
    %56 = arith.truncf %55 : vector<8x8xf32> to vector<8x8xbf16>
    %57 = vector.extract_strided_slice %6 {offsets = [0, 16], sizes = [8, 8], strides = [1, 1]} : vector<8x32xf32> to vector<8x8xf32>
    %58 = arith.truncf %57 : vector<8x8xf32> to vector<8x8xbf16>
    %cst_21 = arith.constant dense<0.000000e+00> : vector<8x8xf32>
    %59 = tpu.matmul %56, %58, %cst_21 {dimension_numbers = #tpu.dot_dimension_numbers<[1], [1], [0], [0], [0, 0, 1, 0], [], []>} : vector<8x8xbf16>, vector<8x8xbf16>, vector<8x8xf32> -> vector<8x8xf32>
    %cst_22 = arith.constant -1.000000e+30 : f32
    %60 = vector.broadcast %cst_22 : f32 to vector<8x8xf32>
    %61 = arith.select %11, %59, %60 : vector<8x8xi1>, vector<8x8xf32>
    %cst_23 = arith.constant dense<0xFF800000> : vector<8xf32>
    %62 = vector.multi_reduction <maximumf>, %61, %cst_23 [1] : vector<8x8xf32> to vector<8xf32>
    %63 = vector.shape_cast %62 : vector<8xf32> to vector<8x1xf32>
    %64 = vector.broadcast %63 : vector<8x1xf32> to vector<8x8xf32>
    %65 = arith.subf %61, %64 : vector<8x8xf32>
    %66 = math.exp %65 : vector<8x8xf32>
    %cst_24 = arith.constant dense<0.000000e+00> : vector<8xf32>
    %67 = vector.multi_reduction <add>, %66, %cst_24 [1] : vector<8x8xf32> to vector<8xf32>
    %68 = vector.shape_cast %67 : vector<8xf32> to vector<8x1xf32>
    %69 = vector.broadcast %68 : vector<8x1xf32> to vector<8x8xf32>
    %70 = arith.divf %66, %69 : vector<8x8xf32>
    %71 = vector.extract_strided_slice %8 {offsets = [0, 256], sizes = [8, 128], strides = [1, 1]} : vector<8x512xf32> to vector<8x128xf32>
    %72 = arith.truncf %71 : vector<8x128xf32> to vector<8x128xbf16>
    %73 = arith.truncf %70 : vector<8x8xf32> to vector<8x8xbf16>
    %cst_25 = arith.constant dense<0.000000e+00> : vector<8x128xf32>
    %74 = tpu.matmul %73, %72, %cst_25 {dimension_numbers = #tpu.dot_dimension_numbers<[1], [0], [0], [1], [0, 0, 1, 1], [], []>} : vector<8x8xbf16>, vector<8x128xbf16>, vector<8x128xf32> -> vector<8x128xf32>
    %75 = arith.addf %54, %74 : vector<8x128xf32>
    %76 = vector.extract_strided_slice %4 {offsets = [0, 24], sizes = [8, 8], strides = [1, 1]} : vector<8x32xf32> to vector<8x8xf32>
    %77 = arith.truncf %76 : vector<8x8xf32> to vector<8x8xbf16>
    %78 = vector.extract_strided_slice %6 {offsets = [0, 24], sizes = [8, 8], strides = [1, 1]} : vector<8x32xf32> to vector<8x8xf32>
    %79 = arith.truncf %78 : vector<8x8xf32> to vector<8x8xbf16>
    %cst_26 = arith.constant dense<0.000000e+00> : vector<8x8xf32>
    %80 = tpu.matmul %77, %79, %cst_26 {dimension_numbers = #tpu.dot_dimension_numbers<[1], [1], [0], [0], [0, 0, 1, 0], [], []>} : vector<8x8xbf16>, vector<8x8xbf16>, vector<8x8xf32> -> vector<8x8xf32>
    %cst_27 = arith.constant -1.000000e+30 : f32
    %81 = vector.broadcast %cst_27 : f32 to vector<8x8xf32>
    %82 = arith.select %11, %80, %81 : vector<8x8xi1>, vector<8x8xf32>
    %cst_28 = arith.constant dense<0xFF800000> : vector<8xf32>
    %83 = vector.multi_reduction <maximumf>, %82, %cst_28 [1] : vector<8x8xf32> to vector<8xf32>
    %84 = vector.shape_cast %83 : vector<8xf32> to vector<8x1xf32>
    %85 = vector.broadcast %84 : vector<8x1xf32> to vector<8x8xf32>
    %86 = arith.subf %82, %85 : vector<8x8xf32>
    %87 = math.exp %86 : vector<8x8xf32>
    %cst_29 = arith.constant dense<0.000000e+00> : vector<8xf32>
    %88 = vector.multi_reduction <add>, %87, %cst_29 [1] : vector<8x8xf32> to vector<8xf32>
    %89 = vector.shape_cast %88 : vector<8xf32> to vector<8x1xf32>
    %90 = vector.broadcast %89 : vector<8x1xf32> to vector<8x8xf32>
    %91 = arith.divf %87, %90 : vector<8x8xf32>
    %92 = vector.extract_strided_slice %8 {offsets = [0, 384], sizes = [8, 128], strides = [1, 1]} : vector<8x512xf32> to vector<8x128xf32>
    %93 = arith.truncf %92 : vector<8x128xf32> to vector<8x128xbf16>
    %94 = arith.truncf %91 : vector<8x8xf32> to vector<8x8xbf16>
    %cst_30 = arith.constant dense<0.000000e+00> : vector<8x128xf32>
    %95 = tpu.matmul %94, %93, %cst_30 {dimension_numbers = #tpu.dot_dimension_numbers<[1], [0], [0], [1], [0, 0, 1, 1], [], []>} : vector<8x8xbf16>, vector<8x128xbf16>, vector<8x128xf32> -> vector<8x128xf32>
    %96 = arith.addf %75, %95 : vector<8x128xf32>
    %c0_31 = arith.constant 0 : index
    %c0_32 = arith.constant 0 : index
    %97 = vector.load %arg5[%c0_31, %c0_32] : memref<1x128xf32, #tpu.memory_space<vmem>>, vector<1x128xf32>
    %98 = vector.broadcast %97 : vector<1x128xf32> to vector<8x128xf32>
    %99 = arith.addf %96, %98 : vector<8x128xf32>
    %c0_33 = arith.constant 0 : index
    %c0_34 = arith.constant 0 : index
    %c0_35 = arith.constant 0 : index
    %100 = vector.load %arg6[%c0_33, %c0_34, %c0_35] : memref<1x8x128xf32, #tpu.memory_space<vmem>>, vector<1x8x128xf32>
    %101 = vector.shape_cast %100 : vector<1x8x128xf32> to vector<8x128xf32>
    %102 = vector.shape_cast %99 : vector<8x128xf32> to vector<1x8x128xf32>
    tpu.vector_store %arg6[%c0_33, %c0_34, %c0_35], %102 {strides = array<i32>} : memref<1x8x128xf32, #tpu.memory_space<vmem>>, vector<1x8x128xf32>,
    return
  }
  func.func @transform_0(%arg0: i32) -> (i32, i32, i32) {
    %c0_i32 = arith.constant 0 : i32
    %c0_i32_0 = arith.constant 0 : i32
    %c0_i32_1 = arith.constant 0 : i32
    return %arg0, %c0_i32, %c0_i32_0 : i32, i32, i32
  }
  func.func @transform_1(%arg0: i32) -> (i32, i32) {
    %c0_i32 = arith.constant 0 : i32
    %c0_i32_0 = arith.constant 0 : i32
    %c0_i32_1 = arith.constant 0 : i32
    return %c0_i32, %c0_i32_0 : i32, i32
  }
  func.func @transform_2(%arg0: i32) -> (i32, i32) {
    %c0_i32 = arith.constant 0 : i32
    %c0_i32_0 = arith.constant 0 : i32
    %c0_i32_1 = arith.constant 0 : i32
    return %c0_i32, %c0_i32_0 : i32, i32
  }
  func.func @transform_3(%arg0: i32) -> (i32, i32) {
    %c0_i32 = arith.constant 0 : i32
    %c0_i32_0 = arith.constant 0 : i32
    %c0_i32_1 = arith.constant 0 : i32
    return %c0_i32, %c0_i32_0 : i32, i32
  }
  func.func @transform_4(%arg0: i32) -> (i32, i32) {
    %c0_i32 = arith.constant 0 : i32
    %c0_i32_0 = arith.constant 0 : i32
    %c0_i32_1 = arith.constant 0 : i32
    return %c0_i32, %c0_i32_0 : i32, i32
  }
  func.func @transform_5(%arg0: i32) -> (i32, i32, i32) {
    %c0_i32 = arith.constant 0 : i32
    %c0_i32_0 = arith.constant 0 : i32
    %c0_i32_1 = arith.constant 0 : i32
    return %arg0, %c0_i32, %c0_i32_0 : i32, i32, i32
  }
}

</mosaic_0001>

<bundles_post_ra>
// kernel: tpu_custom_call.1
= control target key start
LH: loop header
LB: loop body
LE: loop exit
PB: predicated region body
PF: predicated region fallthrough
CT: control target
= control target key end

     0   :  { %10 = vsyncpa [#allocation3], 0  ;;  %s1854_s0 = inlined_call_operand.hbm [shape: f32[2,8,32], index: 0, kind: input, shape index: {}]   ;;  %s1855_s1 = inlined_call_operand.hbm [shape: bf16[32,32], index: 1, kind: input, shape index: {}]   ;;  %s1856_s2 = inlined_call_operand.hbm [shape: bf16[32,32], index: 2, kind: input, shape index: {}]   ;;  %s1857_s3 = inlined_call_operand.hbm [shape: bf16[32,512], index: 3, kind: input, shape index: {}]   ;;  %s1858_s4 = inlined_call_operand.vmem [shape: f32[1,128], index: 4, kind: input, shape index: {}]   ;;  %s1859_s5 = inlined_call_operand.hbm [shape: f32[2,8,128], index: 5, kind: output, shape index: {}]  }
   0x1   :  { %12 = vsyncpa [#allocation3 + $0x1], 0 }
   0x2   :  { %13 = vsyncpa [#allocation6], 0 }
   0x3   :  { %14 = vsyncpa [#allocation9], 0 }
   0x4   :  { %15 = vsyncpa [#allocation4], 0 }
   0x5   :  { %17 = vsyncpa [#allocation4 + $0x1], 0  ;;  %s1577_s18 = smov 0   ;;  %s1579_s19 = smov 0  }
   0x6   :  { %s1581_s20 = smov 0   ;;  %s1583_s21 = smov 0  }
   0x7 LB: > { %s1598_s22 = sadd.s32 4294967295, %s1530_s21   ;;  %s1104_s23 = sadd.s32 4294967294, %s1530_s21   ;;  %s1530_s21 = sphi %s1583_s21, %s1883_s21   ;;  %s1526_s20 = sphi %s1581_s20, %s1882_s20   ;;  %s1522_s19 = sphi %s1579_s19, %s1881_s19   ;;  %s1518_s18 = sphi %s1577_s18, %s1880_s18  }
   0x8   : > { %p43_p0 = scmp.ne.s32.totalorder %s1522_s19, %s1518_s18  ;;  %p1860_p1 = scmp.eq.s32.totalorder %s1598_s22, 0 }
   0x9   : > { %p157_p3 = scmp.eq.s32.totalorder %s1104_s23, 1  ;;  %p1105_p5 = scmp.ge.s32.totalorder %s1530_s21, 1 }
   0xa   : > { %p1607_p4 = por %p1860_p1, %p43_p0  ;;  %p164_p7 = scmp.lt.s32.totalorder %s1530_s21, 3 }
   0xb   : > { %p1612_p6 = por %p157_p3, %p43_p0  ;;  %s1532_s27 = smov [#allocation5]  }
   0xc   : > { %s1864_s24 = scalar_select %p1607_p4, 1, 0 }
   0xd   : > { %s1865_s25 = scalar_select %p1612_p6, 1, 0 }
   0xe   : > { %p1617_p8 = pnand %p1105_p5, %p164_p7  ;;  %s176_s28 = sshll.u32 %s1532_s27, 4  ;;  %s177_s28 = int_to_ptr.vmem [resolvable:$true] %s176_s28 }
   0xf   : > { %s1533_s30 = smov [#allocation7]   ;;  %s1534_s7 = smov [#allocation8]  }
  0x10   : > { %s1866_s26 = scalar_select %p1617_p8, 1, 0 }
  0x11   : > { %p1249_p9 = pneg %p1617_p8  ;;  %s189_s6 = sshll.u32 %s1533_s30, 4  ;;  %s190_s6 = int_to_ptr.vmem [resolvable:$true] %s189_s6 }
  0x12   : > { %s202_s8 = sshll.u32 %s1534_s7, 4  ;;  %s1363_s9 = scalar_lea.vmem %s177_s28, 256  ;;  %s203_s8 = int_to_ptr.vmem [resolvable:$true] %s202_s8 }
  0x13   : > { %p1626_p11 = pnand %p1249_p9, %p1860_p1  ;;  %p1364_p13 = scmp.ne.s32.totalorder %s177_s28, %s1363_s9 }
  0x14   : > { %p1371_p5 = scmp.lt.s32.totalorder %s177_s28, %s177_s28  ;;  %p1372_p7 = scmp.lt.s32.totalorder %s1363_s9, %s1363_s9 }
  0x15   : > { %p1354_p12 = pneg %p1626_p11 }
  0x16   : > { %p1373_p9 = por %p1372_p7, %p1371_p5 }
  0x17   : > { %p1366_p0 = pnand %p1364_p13, %p1354_p12 }
  0x19   : > { %p1367_p3 = pneg %p1366_p0 }
  0x1b   : > { %p1374_p10 = pnand %p1373_p9, %p1367_p3 }
  0x1d   : > { %1377 = shalt.err (!%p1374_p10)
}
  0x1e   : > { %s1535_s10 = smov 64   ;;  %s1536_s11 = smov 4  }
  0x1f   : > { %1252 = dma.hbm_to_vmem [thread:$0]  (!%p1626_p11), %s1855_s1, 256, %s177_s28, [#allocation6], %s1535_s10, %s1535_s10, %s1536_s11  }
  0x20   : > { %s1389_s14 = scalar_lea.vmem %s190_s6, 256  ;;  %p1397_p2 = scmp.lt.s32.totalorder %s190_s6, %s190_s6 }
  0x21   : > { %p1390_p1 = scmp.ne.s32.totalorder %s190_s6, %s1389_s14  ;;  %p1398_p6 = scmp.lt.s32.totalorder %s1389_s14, %s1389_s14 }
  0x23   : > { %p1392_p13 = pnand %p1390_p1, %p1354_p12  ;;  %p1399_p5 = por %p1398_p6, %p1397_p2 }
  0x25   : > { %p1393_p0 = pneg %p1392_p13 }
  0x27   : > { %p1400_p3 = pnand %p1399_p5, %p1393_p0 }
  0x29   : > { %1403 = shalt.err (!%p1400_p3)
}
  0x2a   : > { %1255 = dma.hbm_to_vmem [thread:$0]  (!%p1626_p11), %s1856_s2, 256, %s190_s6, [#allocation6], %s1535_s10, %s1535_s10, %s1536_s11  }
  0x2b   : > { %s1415_s17 = scalar_lea.vmem %s203_s8, 1024  ;;  %p1423_p9 = scmp.lt.s32.totalorder %s203_s8, %s203_s8 }
  0x2c   : > { %p1416_p10 = scmp.ne.s32.totalorder %s203_s8, %s1415_s17  ;;  %p1424_p13 = scmp.lt.s32.totalorder %s1415_s17, %s1415_s17 }
  0x2e   : > { %p1418_p7 = pnand %p1416_p10, %p1354_p12  ;;  %p1425_p4 = por %p1424_p13, %p1423_p9 }
  0x30   : > { %p1419_p1 = pneg %p1418_p7 }
  0x32   : > { %p1426_p2 = pnand %p1425_p4, %p1419_p1 }
  0x34   : > { %1429 = shalt.err (!%p1426_p2)
}
  0x35   : > { %s1537_s23 = smov 256   ;;  %s1538_s27 = smov 16  }
  0x36   : > { %1258 = dma.hbm_to_vmem [thread:$0]  (!%p1626_p11), %s1857_s3, 1024, %s203_s8, [#allocation9], %s1537_s23, %s1537_s23, %s1538_s27  }
  0x37   : > { %s1657_s6 = sadd.s32 1, %s1530_s21   ;;  %s30_s9 = sadd.s32 1, %s1526_s20 }
  0x38   : > { %s27_s7 = ssub.s32 %s1530_s21, %s1657_s6  ;;  %p37_p6 = scmp.ne.s32.totalorder %s1526_s20, %s1522_s19 }
  0x39   : > { %p28_p4 = scmp.eq.s32.totalorder %s27_s7, 0  ;;  %p38_p12 = scmp.eq.s32.totalorder %s1530_s21, 0 }
  0x3a   : > { %p1270_p0 = scmp.lt.s32.totalorder %s1530_s21, 2  ;;  %p1868_p3 = scmp.eq.s32.totalorder %s1598_s22, 1 }
  0x3b   : > { %s1667_s10 = scalar_select %p28_p4, %s1526_s20, %s30_s9  }
  0x3c   : > { %p39_p5 = por %p38_p12, %p37_p6  ;;  %p1671_p10 = por %p1868_p3, %p37_p6 }
  0x3d   : > { %s219_s29 = sand.u32 1, %s1526_s20   ;;  %s1111_s12 = sshll.u32 %s1530_s21, 7 }
  0x3e   : > { %s1869_s11 = scalar_select %p1671_p10, 1, 0 }
  0x3f   : > { %s1110_s8 = sshll.u32 %s219_s29, 3  ;;  %s1680_s15 = scalar_lea.hbm %s1854_s0, %s1111_s12 }
  0x40   : > { %s223_s16 = scalar_lea.vmem [#allocation2], %s1110_s8  ;;  %p1682_p11 = pnand %p1270_p0, %p39_p5 }
  0x41   : > { %s230_s17 = sshll.u32 %s223_s16, 4  ;;  %s220_s27 = scalar_lea.sflag [#allocation3], %s219_s29  ;;  %s231_s17 = int_to_ptr.vmem [resolvable:$true] %s230_s17 }
  0x42   : > { %s1430_s28 = scalar_lea.hbm %s1680_s15, 128  ;;  %p1432_p1 = pneg %p1682_p11 }
  0x43   : > { %p1431_p7 = scmp.ne.s32.totalorder %s1680_s15, %s1430_s28  ;;  %s1435_s9 = scalar_lea.hbm %s1854_s0, 256 }
  0x44   : > { %p1436_p2 = scmp.lt.s32.totalorder %s1680_s15, %s1854_s0  ;;  %p1437_p4 = scmp.lt.s32.totalorder %s1435_s9, %s1430_s28 }
  0x45   : > { %p1433_p9 = pnand %p1432_p1, %p1431_p7 }
  0x46   : > { %p1438_p6 = por %p1437_p4, %p1436_p2 }
  0x47   : > { %p1434_p13 = pneg %p1433_p9 }
  0x49   : > { %p1439_p12 = pnand %p1438_p6, %p1434_p13 }
  0x4b   : > { %1442 = shalt.err (!%p1439_p12)
}
  0x4c   : > { %s1443_s13 = scalar_lea.vmem %s231_s17, 128  ;;  %s1539_s29 = smov [#allocation2]  }
  0x4d   : > { %p1444_p0 = scmp.ne.s32.totalorder %s231_s17, %s1443_s13  ;;  %s1448_s14 = sshll.u32 %s1539_s29, 4  ;;  %s1449_s14 = int_to_ptr.vmem [resolvable:$false] %s1448_s14 }
  0x4e   : > { %s1450_s16 = scalar_lea.vmem %s1449_s14, 256  ;;  %p1451_p7 = scmp.lt.s32.totalorder %s231_s17, %s1449_s14 }
  0x4f   : > { %p1446_p5 = pnand %p1444_p0, %p1432_p1  ;;  %p1452_p9 = scmp.lt.s32.totalorder %s1450_s16, %s1443_s13 }
  0x51   : > { %p1447_p3 = pneg %p1446_p5  ;;  %p1453_p10 = por %p1452_p9, %p1451_p7 }
  0x53   : > { %p1454_p8 = pnand %p1453_p10, %p1447_p3 }
  0x55   : > { %1457 = shalt.err (!%p1454_p8)
}
  0x56   : > { %1262 = dma.hbm_to_vmem [thread:$0]  (!%p1682_p11), %s1680_s15, 128, %s231_s17, %s220_s27  }
  0x57   : > { %p1871_p13 = scmp.ne.s32.totalorder %s1866_s26, 0 }
  0x58   : > { %s1703_s28 = sand.u32 (!%p1871_p13), 1, %s1522_s19   ;;  %p1872_p10 = scmp.ne.s32.totalorder (!%p1871_p13), %s1864_s24, 0 }
  0x59   : > { %239 = sbr.rel (%p1871_p13) target bundleno = 1672 (0x688), region = 40  ;;  %s1113_s30 = sshll.u32 (!%p1871_p13), %s1703_s28, 3 }
  0x5a   : > { %s242_s7 = scalar_lea.sflag (!%p1871_p13), [#allocation3], %s1703_s28  ;;  %s245_s9 = scalar_lea.vmem (!%p1871_p13), [#allocation2], %s1113_s30 }
  0x5e   : > { %1501 = dma.done.wait (%p1872_p10), %s242_s7, 128  }
  0x5f   : > { %1503 = vsyncadd (%p1872_p10), %s242_s7, 4294967168  ;;  %p1873_p8 = scmp.eq.s32.totalorder %s1598_s22, 0 }
  0x61   : > { %1505 = dma.done.wait (%p1873_p8), [#allocation6], 512   ;;  %p1874_p11 = pmov %p1873_p8 }
  0x62   : > { %p1875_p1 = pmov %p1873_p8 }
  0x63   : > { %1507 = vsyncadd (%p1874_p11), [#allocation6], 4294966784 }
  0x64   : > { %1509 = dma.done.wait (%p1875_p1), [#allocation9], 1024   ;;  %p1876_p2 = pmov %p1875_p1 }
  0x65   : > { %v1540_v0 = vmov 0.0   ;;  %vm1541_vm0 = vmmov 0   ;;  %v1320_v1 = vld [vmem:[#allocation7 + $0x8] sm:$0xff]   ;;  %v1321_v2 = vld [vmem:[#allocation5 + $0x8] sm:$0xff]   ;;  %v1322_v3 = vld [vmem:[#allocation7] sm:$0xff]   ;;  %vm303_vm1 = vcmask 261120   ;;  %v533_v46 = vlaneseq }
  0x66   : > { %1511 = vsyncadd (%p1876_p2), [#allocation9], 4294966272  ;;  %1177 = vmatprep.subr.bf16.mxu1 %v1540_v0  ;;  %1169 = vmatprep.subr.bf16.mxu0 %v1540_v0  ;;  %v1323_v4 = vld [vmem:[#allocation5] sm:$0xff]   ;;  %v285_v5 = vld [vmem:[%s245_s9] sm:$0xff]  ;;  %v1542_v11 = vmov 0   ;;  %vm540_vm2 = vcmask 64512  }
  0x67   : > { %1181 = vmatprep.mubr.msk.bf16.mxu1 %vm1541_vm0, %v1540_v0  ;;  %1173 = vmatprep.mubr.msk.bf16.mxu0 %vm1541_vm0, %v1540_v0  ;;  %v286_v6 = vpack.c.bf16 %v285_v5, %v285_v5  ;;  %v1326_v7 = vld [vmem:[#allocation8 + $0x24] ss:$16 sps:$4 sm:$0xff]   ;;  %v1324_v8 = vld [vmem:[#allocation8 + $0x20] ss:$16 sps:$4 sm:$0xff]   ;;  %v1330_v12 = vld [vmem:[#allocation8 + $0x28] ss:$16 sps:$4 sm:$0xff]  }
  0x68   : > { %1178 = vmatpush3.bf16.msra.mxu1 %v1320_v1  ;;  %1170 = vmatpush3.bf16.msra.mxu0 %v1321_v2  ;;  %v1329_v9 = vld [vmem:[#allocation8 + $0x4] ss:$16 sps:$4 sm:$0xff]   ;;  %v1327_v10 = vld [vmem:[#allocation8] ss:$16 sps:$4 sm:$0xff]   ;;  %v1332_v13 = vld [vmem:[#allocation8 + $0x2c] ss:$16 sps:$4 sm:$0xff]  }
  0x69   : > { %1179 = vmatprep.subr.bf16.mxu1 %v1540_v0  ;;  %1171 = vmatprep.subr.bf16.mxu0 %v1540_v0  ;;  %v1335_v14 = vld [vmem:[#allocation8 + $0xc] ss:$16 sps:$4 sm:$0xff]   ;;  %v1333_v15 = vld [vmem:[#allocation8 + $0x8] ss:$16 sps:$4 sm:$0xff]   ;;  %s1543_s24 = smov 120   ;;  %s1544_s26 = smov 112  }
  0x6a   : > { %s1545_s15 = smov 104   ;;  %vm670_vm3 = vcmask 1043456   ;;  %v534_v47 = vshrl.u32 %v533_v46, 7  ;;  %v536_v48 = vand.u32 127, %v533_v46  ;;  %s1144_s27 = sshll.u32 %s1598_s22, 7 }
  0x6b   : > { %s283_s12 = scalar_lea.vmem [#allocation10], %s1113_s30  ;;  %s1811_s14 = scalar_lea.hbm %s1859_s5, %s1144_s27 }
  0x6c   : > { %1180 = vmatpush3.bf16.msra.mxu1 %v1322_v3  ;;  %1172 = vmatpush3.bf16.msra.mxu0 %v1323_v4  ;;  %vm537_vm4 = vcmp.le.s32.totalorder %v536_v48, %v534_v47  ;;  %s1005_s8 = sshll.u32 %s283_s12, 4  ;;  %s992_s22 = scalar_lea.sflag [#allocation4], %s1703_s28  ;;  %s1813_s8 = int_to_ptr.vmem [resolvable:$true] %s1005_s8 }
  0x6d   : > { %463 = vmatprep.subr.bf16.mxu0 %v1326_v7  ;;  %504 = vmatprep.subr.bf16.mxu1 %v1332_v13  ;;  %s1458_s16 = scalar_lea.vmem %s1813_s8, 128  ;;  %p1877_p6 = scmp.ne.s32.totalorder %s1869_s11, 0 }
  0x6e   : > { %p1459_p4 = scmp.ne.s32.totalorder %s1813_s8, %s1458_s16  ;;  %s1546_s30 = smov [#allocation10]  }
  0x6f   : > { %1182 = vmatmul.mubr.msk.bf16.vlgmr.msra.gmra.mxu1 %vm303_vm1, %v286_v6  ;;  %1174 = vmatmul.mubr.msk.bf16.vlgmr.msra.gmra.mxu0 %vm303_vm1, %v286_v6  ;;  %s1462_s7 = sshll.u32 %s1546_s30, 4  ;;  %s1463_s7 = int_to_ptr.vmem [resolvable:$false] %s1462_s7 }
  0x70   : > { %464 = vmatpush1.bf16.msra.mxu0 %v1324_v8  ;;  %483 = vmatprep.mubr.bf16.mxu0 %v1542_v11  ;;  %p1460_p12 = pnand %p1459_p4, %p1877_p6  ;;  %s1464_s9 = scalar_lea.vmem %s1463_s7, 256 }
  0x71   : > { %465 = vmatprep.subr.bf16.mxu0 %v1329_v9  ;;  %524 = vmatprep.mubr.bf16.mxu1 %v1542_v11  ;;  %p1465_p5 = scmp.lt.s32.totalorder %s1813_s8, %s1463_s7  ;;  %p1466_p3 = scmp.lt.s32.totalorder %s1464_s9, %s1458_s16 }
  0x72   : > { %505 = vmatpush1.bf16.msra.mxu1 %v1330_v12  ;;  %p1461_p0 = pneg %p1460_p12 }
  0x73   : > { %506 = vmatprep.subr.bf16.mxu1 %v1335_v14  ;;  %p1467_p7 = por %p1466_p3, %p1465_p5 }
  0x74   : > { %466 = vmatpush1.bf16.msra.mxu0 %v1327_v10 }
  0x75   : > { %1185 = vmatprep.subr.bf16.mxu0 %v1540_v0  ;;  %p1468_p9 = pnand %p1467_p7, %p1461_p0 }
  0x76   : > { %507 = vmatpush1.bf16.msra.mxu1 %v1333_v15 }
  0x77   : > { %1132 = vmatmul.mubr.msk.bf16.vlgmr.msra.gmra.mxu0 %vm303_vm1, %v286_v6  ;;  %1191 = vmatprep.subr.bf16.mxu1 %v1540_v0 }
  0x78   : > { %1187 = vmatprep.mubr.msk.bf16.mxu0 %vm1541_vm0, %v1540_v0 }
  0x79   : > { %1133 = vmatmul.mubr.msk.bf16.vlgmr.msra.gmra.mxu1 %vm303_vm1, %v286_v6 }
  0x7a   : > { %1193 = vmatprep.mubr.msk.bf16.mxu1 %vm1541_vm0, %v1540_v0 }
 0x12f   : > { %v397_v16 = vpop.f32.mrf.mxu1  ;;  %v341_v18 = vpop.f32.mrf.mxu0 }
 0x130   : > { %v539_v17 = vpack.c.bf16 %v397_v16, %v397_v16  ;;  %v1739_v20 = vpack.c.bf16 %v341_v18, %v341_v18 }
 0x131   : > { %v1183_v19 = vpop.f32.mrf.mxu1  ;;  %v1175_v22 = vpop.f32.mrf.mxu0 }
 0x132   : > { %605 = vrot.lane.b32.xlu0 %v539_v17, %s1543_s24  ;;  %v545_v21 = vsel %vm540_vm2, %v539_v17, 0 }
 0x133   : > { %v400_v23 = vpop.f32.mrf.mxu1  ;;  %1186 = vmatpush3.bf16.xpose.msra.mxu0 %v545_v21  ;;  %v344_v24 = vpop.f32.mrf.mxu0 }
 0x134   : > { %1197 = vmatprep.subr.bf16.mxu0 %v1540_v0 }
 0x135   : > { %v1184_v25 = vpop.f32.mrf.mxu1  ;;  %v1176_v26 = vpop.f32.mrf.mxu0 }
 0x136   : > { %602 = vrot.lane.b32.xlu0 %v1739_v20, %s1543_s24 }
 0x137   : > { %v485_v27 = vpop.f32.mrf.mxu0 }
 0x138   : > { %v599_v43 = vpack.c.bf16 %v485_v27, %v485_v27 }
 0x139   : > { %v487_v28 = vpop.f32.mrf.mxu0  ;;  %v526_v33 = vpop.f32.mrf.mxu1 }
 0x13a   : > { %762 = vrot.lane.b32.xlu0 %v539_v17, %s1544_s26  ;;  %1188 = vmatmul.mubr.msk.bf16.vlgmr.msra.gmra.mxu0 %vm540_vm2, %v1739_v20  ;;  %v665_v29 = vpack.c.bf16 %v487_v28, %v487_v28  ;;  %v822_v34 = vpack.c.bf16 %v526_v33, %v526_v33  ;;  %v718_v44 = vsel %vm670_vm3, %v599_v43, 0 }
 0x13b   : > { %1199 = vmatprep.mubr.msk.bf16.mxu0 %vm1541_vm0, %v1540_v0  ;;  %v489_v30 = vpop.f32.mrf.mxu0  ;;  %v528_v35 = vpop.f32.mrf.mxu1 }
 0x13c   : > { %v672_v31 = vsel %vm670_vm3, %v665_v29, 0  ;;  %v1753_v36 = vsel %vm670_vm3, %v822_v34, 0  ;;  %v933_v37 = vpack.c.bf16 %v528_v35, %v528_v35 }
 0x13d   : > { %v490_v32 = vpop.f32.mrf.mxu0  ;;  %1198 = vmatpush3.bf16.msra.mxu0 %v672_v31  ;;  %v530_v38 = vpop.f32.mrf.mxu1 }
 0x13e   : > { %873 = vrot.lane.b32.xlu0 %v539_v17, %s1545_s15  ;;  %1209 = vmatprep.subr.bf16.mxu0 %v1540_v0  ;;  %v1756_v39 = vsel %vm670_vm3, %v933_v37, 0 }
 0x13f   : > { %v531_v40 = vpop.f32.mrf.mxu1 }
 0x142   : > { %871 = vrot.lane.b32.xlu0 %v1739_v20, %s1545_s15 }
 0x1a4   : > { %v606_v41 = vpop.permute.xlu0 %605 }
 0x1a5   : > { %v611_v42 = vsel %vm540_vm2, %v606_v41, 0 }
 0x1a6   : > { %1192 = vmatpush3.bf16.xpose.msra.mxu1 %v611_v42 }
 0x1a7   : > { %1203 = vmatprep.subr.bf16.mxu1 %v1540_v0 }
 0x1a8   : > { %v603_v45 = vpop.permute.xlu0 %602 }
 0x1ac   : > { %v763_v6 = vpop.permute.xlu0 %762 }
 0x1ad   : > { %1194 = vmatmul.mubr.msk.bf16.vlgmr.msra.gmra.mxu1 %vm540_vm2, %v603_v45  ;;  %v768_v8 = vsel %vm540_vm2, %v763_v6, 0 }
 0x1ae   : > { %1204 = vmatpush3.bf16.msra.mxu1 %v718_v44  ;;  %1205 = vmatprep.mubr.msk.bf16.mxu1 %vm1541_vm0, %v1540_v0 }
 0x1af   : > { %1215 = vmatprep.subr.bf16.mxu1 %v1540_v0 }
 0x1b0   : > { %v874_v9 = vpop.permute.xlu0 %873 }
 0x1b1   : > { %v879_v11 = vsel %vm540_vm2, %v874_v9, 0 }
 0x1b4   : > { %v872_v12 = vpop.permute.xlu0 %871 }
 0x1fa   : > { %v581_v49 = vpop.f32.mrf.mxu0 }
 0x1fb   : > { %v587_v50 = vsel %vm537_vm4, %v581_v49, -1e+30 }
 0x1fc   : > { %v1189_v51 = vpop.f32.mrf.mxu0  ;;  %v588_v52 = vsel %vm540_vm2, %v587_v50, -inf }
 0x1fd   : > { %589 = vmax.xlane.f32.xlu0 %v588_v52 }
 0x1fe   : > { %v584_v53 = vpop.f32.mrf.mxu0 }
 0x200   : > { %v1190_v54 = vpop.f32.mrf.mxu0 }
 0x26d   : > { %v647_v55 = vpop.f32.mrf.mxu1 }
 0x26e   : > { %v653_v56 = vsel %vm537_vm4, %v647_v55, -1e+30 }
 0x26f   : > { %v1195_v57 = vpop.f32.mrf.mxu1  ;;  %v654_v58 = vsel %vm540_vm2, %v653_v56, -inf }
 0x270   : > { %655 = vmax.xlane.f32.xlu1 %v654_v58 }
 0x271   : > { %v650_v59 = vpop.f32.mrf.mxu1 }
 0x273   : > { %v1196_v60 = vpop.f32.mrf.mxu1 }
 0x286   : > { %v590_v13 = vpop.xlane.xlu0 %589 }
 0x287   : > { %v591_v14 = vsub.f32 %v587_v50, %v590_v13 }
 0x289   : > { %v592_v16 = vmul.f32 1.442695, %v591_v14 }
 0x2f9   : > { %v656_v61 = vpop.xlane.xlu1 %655 }
 0x2fa   : > { %v657_v62 = vsub.f32 %v653_v56, %v656_v61 }
 0x2fc   : > { %v658_v63 = vmul.f32 1.442695, %v657_v62 }
 0x2fe   : > { %1336 = vpow2.f32 %v658_v63 }
 0x30b   : > { %v1337_v1 = vpop.eup %1336 }
 0x30c   : > { %v660_v2 = vsel %vm540_vm2, %v1337_v1, 0.0 }
 0x30d   : > { %661 = vadd.xlane.f32.xlu1 %v660_v2 }
 0x31e   : > { %760 = vrot.lane.b32.xlu1 %v1739_v20, %s1544_s26 }
 0x396   : > { %v662_v3 = vpop.xlane.xlu1 %661 }
 0x397   : > { %1338 = vrcp.f32 %v662_v3  ;;  %v1142_v3 = vld [vmem:[%s1858_s4] ss:$0 sm:$0xff] }
 0x398   : > { %1340 = vpow2.f32 %v592_v16 }
 0x39a   : > { %v761_v10 = vpop.permute.xlu1 %760 }
 0x3a4   : > { %v1339_v4 = vpop.eup %1338 }
 0x3a5   : > { %v664_v5 = vmul.f32 %v1339_v4, %v1337_v1  ;;  %v1341_v30 = vpop.eup %1340 }
 0x3a6   : > { %v594_v33 = vsel %vm540_vm2, %v1341_v30, 0.0 }
 0x3a7   : > { %v666_v7 = vpack.c.bf16 %v664_v5, %v664_v5 }
 0x3a9   : > { %1200 = vmatmul.mubr.msk.bf16.vlgmr.msra.gmra.mxu0 %vm540_vm2, %v666_v7 }
 0x3aa   : > { %1210 = vmatpush3.bf16.xpose.msra.mxu0 %v768_v8  ;;  %1211 = vmatprep.mubr.msk.bf16.mxu0 %vm1541_vm0, %v1540_v0 }
 0x3ab   : > { %1221 = vmatprep.subr.bf16.mxu0 %v1540_v0 }
 0x3b1   : > { %1212 = vmatmul.mubr.msk.bf16.vlgmr.msra.gmra.mxu0 %vm540_vm2, %v761_v10 }
 0x3b2   : > { %1222 = vmatpush3.bf16.xpose.msra.mxu0 %v879_v11  ;;  %1223 = vmatprep.mubr.msk.bf16.mxu0 %vm1541_vm0, %v1540_v0 }
 0x3b9   : > { %1224 = vmatmul.mubr.msk.bf16.vlgmr.msra.gmra.mxu0 %vm540_vm2, %v872_v12 }
 0x469   : > { %v1782_v15 = vpop.f32.mrf.mxu0 }
 0x46b   : > { %v1201_v17 = vpop.f32.mrf.mxu0 }
 0x46d   : > { %v711_v18 = vpop.f32.mrf.mxu0 }
 0x46f   : > { %v1202_v19 = vpop.f32.mrf.mxu0 }
 0x471   : > { %v804_v20 = vpop.f32.mrf.mxu0 }
 0x472   : > { %v810_v21 = vsel %vm537_vm4, %v804_v20, -1e+30 }
 0x473   : > { %v1213_v22 = vpop.f32.mrf.mxu0  ;;  %v811_v23 = vsel %vm540_vm2, %v810_v21, -inf }
 0x474   : > { %812 = vmax.xlane.f32.xlu1 %v811_v23 }
 0x475   : > { %v807_v24 = vpop.f32.mrf.mxu0 }
 0x477   : > { %v1214_v25 = vpop.f32.mrf.mxu0 }
 0x479   : > { %v915_v26 = vpop.f32.mrf.mxu0 }
 0x47a   : > { %v921_v27 = vsel %vm537_vm4, %v915_v26, -1e+30 }
 0x47b   : > { %v1225_v28 = vpop.f32.mrf.mxu0  ;;  %v922_v29 = vsel %vm540_vm2, %v921_v27, -inf }
 0x47c   : > { %923 = vmax.xlane.f32.xlu0 %v922_v29 }
 0x47d   : > { %v918_v31 = vpop.f32.mrf.mxu0 }
 0x47f   : > { %v1226_v32 = vpop.f32.mrf.mxu0 }
 0x480   : > { %595 = vadd.xlane.f32.xlu0 %v594_v33 }
 0x4fd   : > { %v813_v34 = vpop.xlane.xlu1 %812 }
 0x4fe   : > { %v814_v35 = vsub.f32 %v810_v21, %v813_v34 }
 0x500   : > { %v815_v37 = vmul.f32 1.442695, %v814_v35 }
 0x502   : > { %1342 = vpow2.f32 %v815_v37 }
 0x505   : > { %v924_v38 = vpop.xlane.xlu0 %923 }
 0x506   : > { %v925_v40 = vsub.f32 %v921_v27, %v924_v38 }
 0x508   : > { %v926_v41 = vmul.f32 1.442695, %v925_v40 }
 0x509   : > { %v596_v42 = vpop.xlane.xlu0 %595 }
 0x50a   : > { %1344 = vpow2.f32 %v926_v41 }
 0x50b   : > { %1346 = vrcp.f32 %v596_v42 }
 0x50f   : > { %v1343_v43 = vpop.eup %1342 }
 0x510   : > { %v817_v44 = vsel %vm540_vm2, %v1343_v43, 0.0 }
 0x511   : > { %818 = vadd.xlane.f32.xlu0 %v817_v44 }
 0x517   : > { %v1345_v45 = vpop.eup %1344 }
 0x518   : > { %v1347_v46 = vpop.eup %1346  ;;  %v928_v47 = vsel %vm540_vm2, %v1345_v45, 0.0 }
 0x519   : > { %929 = vadd.xlane.f32.xlu1 %v928_v47  ;;  %v598_v48 = vmul.f32 %v1347_v46, %v1341_v30 }
 0x51b   : > { %v600_v49 = vpack.c.bf16 %v598_v48, %v598_v48 }
 0x51d   : > { %1206 = vmatmul.mubr.msk.bf16.vlgmr.msra.gmra.mxu1 %vm540_vm2, %v600_v49 }
 0x51e   : > { %1216 = vmatpush3.bf16.msra.mxu1 %v1753_v36  ;;  %1217 = vmatprep.mubr.msk.bf16.mxu1 %vm1541_vm0, %v1540_v0 }
 0x51f   : > { %1227 = vmatprep.subr.bf16.mxu1 %v1540_v0 }
 0x59a   : > { %v819_v50 = vpop.xlane.xlu0 %818 }
 0x59b   : > { %1348 = vrcp.f32 %v819_v50 }
 0x5a2   : > { %v930_v51 = vpop.xlane.xlu1 %929 }
 0x5a3   : > { %1350 = vrcp.f32 %v930_v51 }
 0x5a8   : > { %v1349_v52 = vpop.eup %1348 }
 0x5a9   : > { %v821_v53 = vmul.f32 %v1349_v52, %v1343_v43 }
 0x5ab   : > { %v823_v54 = vpack.c.bf16 %v821_v53, %v821_v53 }
 0x5ad   : > { %1218 = vmatmul.mubr.msk.bf16.vlgmr.msra.gmra.mxu1 %vm540_vm2, %v823_v54 }
 0x5ae   : > { %1228 = vmatpush3.bf16.msra.mxu1 %v1756_v39  ;;  %1229 = vmatprep.mubr.msk.bf16.mxu1 %vm1541_vm0, %v1540_v0 }
 0x5b0   : > { %v1351_v36 = vpop.eup %1350 }
 0x5b1   : > { %v932_v55 = vmul.f32 %v1351_v36, %v1345_v45 }
 0x5b3   : > { %v934_v56 = vpack.c.bf16 %v932_v55, %v932_v55 }
 0x5b5   : > { %1230 = vmatmul.mubr.msk.bf16.vlgmr.msra.gmra.mxu1 %vm540_vm2, %v934_v56 }
 0x5dd   : > { %v754_v57 = vpop.f32.mrf.mxu1 }
 0x5de   : > { %v755_v1 = vadd.f32 %v754_v57, %v1782_v15 }
 0x5df   : > { %v1207_v58 = vpop.f32.mrf.mxu1 }
 0x5e1   : > { %v757_v59 = vpop.f32.mrf.mxu1 }
 0x5e3   : > { %v1208_v60 = vpop.f32.mrf.mxu1 }
 0x66d   : > { %v864_v61 = vpop.f32.mrf.mxu1 }
 0x66e   : > { %v870_v2 = vadd.f32 %v864_v61, %v755_v1 }
 0x66f   : > { %v1219_v62 = vpop.f32.mrf.mxu1 }
 0x671   : > { %v867_v63 = vpop.f32.mrf.mxu1 }
 0x673   : > { %v1220_v39 = vpop.f32.mrf.mxu1 }
 0x675   : > { %v975_v0 = vpop.f32.mrf.mxu1 }
 0x676   : > { %v981_v4 = vadd.f32 %v975_v0, %v870_v2 }
 0x677   : > { %v1231_v5 = vpop.f32.mrf.mxu1 }
 0x678   : > { %v989_v6 = vadd.f32 %v1142_v3, %v981_v4 }
 0x679   : > { %v978_v7 = vpop.f32.mrf.mxu1 }
 0x67a   : > { %990 = vst [vmem:[%s283_s12] sm:$0xff] %v989_v6 }
 0x67b   : > { %v1232_v8 = vpop.f32.mrf.mxu1 }
 0x67c   : > { %1471 = shalt.err (!%p1468_p9)
}
 0x67d   : > { %s1472_s24 = scalar_lea.hbm %s1811_s14, 128  ;;  %s1476_s15 = scalar_lea.hbm %s1859_s5, 256 }
 0x67e   : > { %p1473_p13 = scmp.ne.s32.totalorder %s1811_s14, %s1472_s24  ;;  %p1477_p11 = scmp.lt.s32.totalorder %s1811_s14, %s1859_s5 }
 0x67f   : > { %p1478_p1 = scmp.lt.s32.totalorder %s1476_s15, %s1472_s24 }
 0x680   : > { %p1474_p10 = pnand %p1473_p13, %p1877_p6 }
 0x681   : > { %p1479_p2 = por %p1478_p1, %p1477_p11 }
 0x682   : > { %p1475_p8 = pneg %p1474_p10 }
 0x684   : > { %p1480_p4 = pnand %p1479_p2, %p1475_p8 }
 0x686   : > { %1483 = shalt.err (!%p1480_p4)
}
 0x687   : > { %1247 = dma.vmem_to_hbm [thread:$0]  (%p1877_p6), %s1813_s8, 128, %s1811_s14, %s992_s22  }
 0x688 PF: > { %s1017_s27 = sand.u32 1, %s1518_s18   ;;  %p1878_p12 = scmp.ne.s32.totalorder %s1865_s25, 0 }
 0x689   : > { %p1879_p0 = scmp.ge.s32.totalorder %s1530_s21, 2  ;;  %s1018_s12 = scalar_lea.sflag [#allocation4], %s1017_s27 }
 0x68b   : > { %p1264_p5 = pnand %p1879_p0, %p1878_p12 }
 0x68d   : > { %p1265_p3 = pneg %p1264_p5 }
 0x68f   : > { %1513 = dma.done.wait (%p1265_p3), %s1018_s12, 128  }
 0x690   : > { %1515 = vsyncadd (%p1265_p3), %s1018_s12, 4294967168  ;;  %p20_p7 = scmp.ge.s32.totalorder %s1657_s6, 4   ;;  %s1880_s18 = smov %s1522_s19 }
 0x691   : > { %s1881_s19 = smov %s1526_s20  ;;  %s1882_s20 = smov %s1667_s10 }
 0x692   : > { %s1883_s21 = smov %s1657_s6  ;;  %22 = sbr.rel (!%p20_p7) target bundleno = 7 (0x7), region = 97 }
 0x697   :  { %1023 = vsyncpa [#allocation3], 1 }
 0x698   :  { %1025 = vsyncpa [#allocation3 + $0x1], 1 }
 0x699   :  { %1026 = vsyncpa [#allocation6], 1 }
 0x69a   :  { %1027 = vsyncpa [#allocation9], 1 }
 0x69b   :  { %1028 = vsyncpa [#allocation4], 1 }
 0x69c   :  { %1030 = vsyncpa [#allocation4 + $0x1], 1 }

</bundles_post_ra>
